<compile_context>
chip_gen: v5e
topology: v5e:2x2
jax: 0.10.0
libtpu: 0.0.40
codegen_flags: <defaults>
</compile_context>

<pallas_src>
import functools
import math

import jax
import jax.numpy as jnp
import numpy as np
from jax.experimental import pallas as pl
from jax.experimental.pallas import tpu as pltpu


def _round_up(x, m):
    return ((x + m - 1) // m) * m


def _tpu_cores_and_vmem():
    """Best-effort (tensorcores_per_chip, vmem_bytes_per_core)."""
    try:
        kind = jax.devices()[0].device_kind.lower()
    except Exception:
        kind = ""
    if "v7" in kind or "tpu7" in kind or "7x" in kind:
        return 2, 64 * 1024 * 1024          # v7x: 2 TCs/chip, 64 MiB VMEM per TC
    return 1, 128 * 1024 * 1024             # v5e / v6e: 1 TC, 128 MiB VMEM


def _pick_batch_tile(b, x_bytes_per_batch, out_bytes_per_batch, const_bytes,
                     n_cores, vmem_budget):
    """Largest batch tile that fits the VMEM budget; on multi-TC chips prefer a
    grid that splits evenly across cores."""
    divisors = [d for d in range(1, b + 1) if b % d == 0]

    def fits(bt):
        # double-buffered x/out tiles + double-buffered weights/bias
        need = 2 * bt * (x_bytes_per_batch + out_bytes_per_batch) + 2 * const_bytes
        return need <= vmem_budget

    fitting = [d for d in divisors if fits(d)] or [1]
    if n_cores <= 1:
        return max(fitting)                 # minimize per-step overhead on 1-TC chips
    even = [d for d in fitting if (b // d) % n_cores == 0]
    return max(even) if even else max(fitting)


def _prepare_weights(weight, bias, c, c_pad, out_dim, o_pad):
    """One-time host-side split/permute/pad of the nn.Linear params into the
    kernel's level-4 / level-2 / level-1 layouts.

    PyTorch feature index: f = ch*21 + k, k in [1x1 (0), 2x2 row-major (1..4),
    4x4 row-major (5..20)].  Kernel lane orders:
      lvl4: (di, dj, I, J, ch_pad)   lvl2: (I, J, ch_pad)   lvl1: (ch_pad)
    where the 4x4 cell (r, s) = (2I+di, 2J+dj) and the 2x2 cell is (I, J).
    """
    w_r = weight.reshape(out_dim, c, 21)
    w1 = np.zeros((c_pad, o_pad), np.float32)
    w2 = np.zeros((4 * c_pad, o_pad), np.float32)
    w4 = np.zeros((16 * c_pad, o_pad), np.float32)
    w1[:c, :out_dim] = w_r[:, :, 0].T
    for I in range(2):
        for J in range(2):
            ij = 2 * I + J
            w2[ij * c_pad: ij * c_pad + c, :out_dim] = w_r[:, :, 1 + ij].T
            for di in range(2):
                for dj in range(2):
                    m = (2 * di + dj) * 4 + ij          # kernel lane group (di,dj,I,J)
                    r, s = 2 * I + di, 2 * J + dj       # torch 4x4 cell (row, col)
                    w4[m * c_pad: m * c_pad + c, :out_dim] = w_r[:, :, 5 + 4 * r + s].T
    bk = np.zeros((1, o_pad), np.float32)
    bk[0, :out_dim] = bias
    return jnp.asarray(w4), jnp.asarray(w2), jnp.asarray(w1), jnp.asarray(bk)


def _spp_kernel(x_ref, w4_ref, w2_ref, w1_ref, b_ref, o_ref, *, c_pad, n_groups):
    w16 = 16 * c_pad                            # multiple of 128 by construction

    # level-4: max over the g within-window pixel groups, sliced straight from
    # the ref (the whole tile is never materialized in vregs).
    lvl4 = x_ref[:, 0:w16]
    for k in range(1, n_groups):
        lvl4 = jnp.maximum(lvl4, x_ref[:, k * w16:(k + 1) * w16])
    # lvl4 lanes: (di, dj, I, J, ch_pad)

    # level-2: reduce the (di, dj) digits (contiguous 4*c_pad slabs)
    c4 = 4 * c_pad
    lvl2 = jnp.maximum(jnp.maximum(lvl4[:, 0:c4], lvl4[:, c4:2 * c4]),
                       jnp.maximum(lvl4[:, 2 * c4:3 * c4], lvl4[:, 3 * c4:4 * c4]))
    # level-1: reduce the (I, J) digits
    lvl1 = jnp.maximum(jnp.maximum(lvl2[:, 0:c_pad], lvl2[:, c_pad:2 * c_pad]),
                       jnp.maximum(lvl2[:, 2 * c_pad:3 * c_pad], lvl2[:, 3 * c_pad:4 * c_pad]))

    # fused linear: three accumulated MXU matmuls on pre-split weights,
    # output already lane-dense (o_pad multiple of 128) and in final layout.
    res = jnp.dot(lvl4, w4_ref[...], preferred_element_type=jnp.float32)
    res = res + jnp.dot(lvl2, w2_ref[...], preferred_element_type=jnp.float32)
    res = res + jnp.dot(lvl1, w1_ref[...], preferred_element_type=jnp.float32)
    o_ref[...] = (res + b_ref[...]).astype(o_ref.dtype)


def make_spp_forward(weight, bias, *, patch_size=8):
    """Build a jitted SPP forward; kernel-layout params are prepared once here."""
    weight = np.asarray(weight, np.float32)
    bias = np.asarray(bias, np.float32)
    out_dim, fan_in = weight.shape
    assert fan_in % 21 == 0
    c = fan_in // 21
    c_pad = _round_up(c, 8)           # 16*c_pad % 128 == 0 -> aligned max slabs
    o_pad = _round_up(out_dim, 128)   # lane-dense output stores

    w4, w2, w1, bk = _prepare_weights(weight, bias, c, c_pad, out_dim, o_pad)
    n_cores, vmem_phys = _tpu_cores_and_vmem()

    P = patch_size
    PP = P * P

    @jax.jit
    def forward(x):
        b, cx, h, wd = x.shape
        assert cx == c
        assert h % P == 0 and wd % P == 0
        Nh, Nw = h // P, wd // P
        # TODO(synk): only the evenly divisible case (Nh % 4 == 0, Nw % 4 == 0) is
        # handled; MaxPool2d's ceil/padded pooling branch is not implemented.
        assert Nh % 4 == 0 and Nw % 4 == 0
        gh, gw = Nh // 4, Nw // 4
        g = gh * gw

        # ---- batch tile (generation aware, VMEM-budget checked) ----------
        vmem_budget = (vmem_phys * 3) // 4
        x_bytes = PP * g * 16 * c_pad * 4
        out_bytes = PP * o_pad * 4
        const_bytes = (21 * c_pad + 1) * o_pad * 4
        bt = _pick_batch_tile(b, x_bytes, out_bytes, const_bytes, n_cores, vmem_budget)
        T = b // bt

        # ---- rearrange input into the kernel layout -----------------------
        # rows = (batch, patch-pixel n = ph*P + pw)
        # lanes = (qh, qw, di, dj, I, J, ch_pad)   with nh = (2I+di)*gh + qh, etc.
        # Kept inside this jit; allow_input_fusion lets XLA fuse it into the
        # pallas_call input fetch (no separate HBM round trip).
        xp = x if c_pad == c else jnp.pad(x, ((0, 0), (0, c_pad - c), (0, 0), (0, 0)))
        x1 = xp.reshape(b, c_pad, P, 2, 2, gh, P, 2, 2, gw)
        #     axes:     0  1      2  3  4  5   6  7  8  9
        #               b  ch     ph I  di qh  pw J  dj qw
        x2 = x1.transpose(0, 2, 6, 5, 9, 4, 8, 3, 7, 1)
        xk = x2.reshape(b * PP, g * 16 * c_pad)

        kernel = functools.partial(_spp_kernel, c_pad=c_pad, n_groups=g)
        cost = pl.CostEstimate(
            flops=int(2 * b * PP * 21 * c_pad * o_pad),
            transcendentals=0,
            bytes_accessed=int(xk.size + w4.size + w2.size + w1.size + bk.size
                               + b * PP * o_pad) * 4,
        )

        out = pl.pallas_call(
            kernel,
            out_shape=jax.ShapeDtypeStruct((b * PP, o_pad), jnp.float32),
            grid=(T,),
            in_specs=[
                pl.BlockSpec((bt * PP, g * 16 * c_pad), lambda i: (i, 0)),
                pl.BlockSpec((16 * c_pad, o_pad), lambda i: (0, 0)),
                pl.BlockSpec((4 * c_pad, o_pad), lambda i: (0, 0)),
                pl.BlockSpec((c_pad, o_pad), lambda i: (0, 0)),
                pl.BlockSpec((1, o_pad), lambda i: (0, 0)),
            ],
            out_specs=pl.BlockSpec((bt * PP, o_pad), lambda i: (i, 0)),
            compiler_params=pltpu.CompilerParams(
                dimension_semantics=("parallel",),
                allow_input_fusion=[True, False, False, False, False],
                vmem_limit_bytes=vmem_budget,
            ),
            cost_estimate=cost,
        )(xk, w4, w2, w1, bk)

        out = out.reshape(b, PP, o_pad)
        return out if o_pad == out_dim else out[:, :, :out_dim]

    return forward


def spp_reference(x, weight, bias, patch_size=8):
    """Plain-JAX reference replicating the PyTorch forward (divisible case)."""
    b, c, h, w = x.shape
    P = patch_size
    Nh, Nw = h // P, w // P
    x5 = x.reshape(b, c, P, Nh, P, Nw).transpose(0, 1, 2, 4, 3, 5)
    x5 = x5.reshape(b, c, P * P, Nh, Nw)
    xf = x5.reshape(b * c, P * P, Nh, Nw)
    parts = []
    for p in (1, 2, 4):
        pooled = xf.reshape(b * c, P * P, p, Nh // p, p, Nw // p).max(axis=(3, 5))
        parts.append(pooled.reshape(b * c, P * P, p * p))
    feat = jnp.concatenate(parts, axis=2).reshape(b, c, P * P, 21)
    feat = feat.transpose(0, 2, 1, 3).reshape(b, P * P, c * 21)
    return jnp.einsum("bnf,of->bno", feat, weight,
                      precision=jax.lax.Precision.HIGHEST,
                      preferred_element_type=jnp.float32) + bias


if __name__ == "__main__":
    # patch_size=8 with h=w=32 gives a 4x4 coarse grid; channels=4, out_dim=64.
    batch, chan, height, width = 4, 4, 32, 32
    patch_size = 8
    out_dim = 64
    fan_in = 21 * chan

    key = jax.random.PRNGKey(0)
    kx, kw, kb = jax.random.split(key, 3)
    x = jax.random.normal(kx, (batch, chan, height, width), jnp.float32)
    bound = 1.0 / math.sqrt(fan_in)
    weight = jax.random.uniform(kw, (out_dim, fan_in), jnp.float32, -bound, bound)
    bias = jax.random.uniform(kb, (out_dim,), jnp.float32, -bound, bound)

    forward = make_spp_forward(weight, bias, patch_size=patch_size)
    out = jax.block_until_ready(forward(x))
    assert out.shape == (batch, patch_size * patch_size, out_dim)

    ref = spp_reference(x, weight, bias, patch_size)
    np.testing.assert_allclose(np.asarray(out), np.asarray(ref),
                               rtol=1e-5, atol=1e-5)
    print("KERNEL_OK")
</pallas_src>

<mosaic_0001>
module attributes {stable_mosaic.version = 11 : i64} {
  func.func @_spp_kernel(%arg0: i32, %arg1: memref<256x128xf32, #tpu.memory_space<vmem>>, %arg2: memref<128x128xf32, #tpu.memory_space<vmem>>, %arg3: memref<32x128xf32, #tpu.memory_space<vmem>>, %arg4: memref<8x128xf32, #tpu.memory_space<vmem>>, %arg5: memref<1x128xf32, #tpu.memory_space<vmem>>, %arg6: memref<256x128xf32, #tpu.memory_space<vmem>>) attributes {dimension_semantics = [#tpu.dimension_semantics<parallel>], iteration_bounds = array<i64: 1>, scalar_prefetch = 0 : i64, scratch_operands = 0 : i64, tpu.core_type = #tpu.core_type<tc>, window_params = [{transform_indices = @transform_0, window_bounds = array<i64: 256, 128>}, {pipeline_mode = #tpu.pipeline_mode<synchronous>, transform_indices = @transform_1, window_bounds = array<i64: 128, 128>}, {pipeline_mode = #tpu.pipeline_mode<synchronous>, transform_indices = @transform_2, window_bounds = array<i64: 32, 128>}, {pipeline_mode = #tpu.pipeline_mode<synchronous>, transform_indices = @transform_3, window_bounds = array<i64: 8, 128>}, {pipeline_mode = #tpu.pipeline_mode<synchronous>, transform_indices = @transform_4, window_bounds = array<i64: 1, 128>}, {transform_indices = @transform_5, window_bounds = array<i64: 256, 128>}]} {
    %c0 = arith.constant 0 : index
    %c0_0 = arith.constant 0 : index
    %0 = vector.load %arg1[%c0, %c0_0] : memref<256x128xf32, #tpu.memory_space<vmem>>, vector<256x128xf32>
    %1 = vector.extract_strided_slice %0 {offsets = [0, 0], sizes = [256, 32], strides = [1, 1]} : vector<256x128xf32> to vector<256x32xf32>
    %2 = vector.extract_strided_slice %0 {offsets = [0, 32], sizes = [256, 32], strides = [1, 1]} : vector<256x128xf32> to vector<256x32xf32>
    %3 = arith.maximumf %1, %2 : vector<256x32xf32>
    %4 = vector.extract_strided_slice %0 {offsets = [0, 64], sizes = [256, 32], strides = [1, 1]} : vector<256x128xf32> to vector<256x32xf32>
    %5 = vector.extract_strided_slice %0 {offsets = [0, 96], sizes = [256, 32], strides = [1, 1]} : vector<256x128xf32> to vector<256x32xf32>
    %6 = arith.maximumf %4, %5 : vector<256x32xf32>
    %7 = arith.maximumf %3, %6 : vector<256x32xf32>
    %8 = vector.extract_strided_slice %7 {offsets = [0, 0], sizes = [256, 8], strides = [1, 1]} : vector<256x32xf32> to vector<256x8xf32>
    %9 = vector.extract_strided_slice %7 {offsets = [0, 8], sizes = [256, 8], strides = [1, 1]} : vector<256x32xf32> to vector<256x8xf32>
    %10 = arith.maximumf %8, %9 : vector<256x8xf32>
    %11 = vector.extract_strided_slice %7 {offsets = [0, 16], sizes = [256, 8], strides = [1, 1]} : vector<256x32xf32> to vector<256x8xf32>
    %12 = vector.extract_strided_slice %7 {offsets = [0, 24], sizes = [256, 8], strides = [1, 1]} : vector<256x32xf32> to vector<256x8xf32>
    %13 = arith.maximumf %11, %12 : vector<256x8xf32>
    %14 = arith.maximumf %10, %13 : vector<256x8xf32>
    %c0_1 = arith.constant 0 : index
    %c0_2 = arith.constant 0 : index
    %15 = vector.load %arg2[%c0_1, %c0_2] : memref<128x128xf32, #tpu.memory_space<vmem>>, vector<128x128xf32>
    %cst = arith.constant dense<0.000000e+00> : vector<256x128xf32>
    %16 = tpu.matmul %0, %15, %cst {dimension_numbers = #tpu.dot_dimension_numbers<[1], [0], [0], [1], [0, 0, 1, 1], [], []>} : vector<256x128xf32>, vector<128x128xf32>, vector<256x128xf32> -> vector<256x128xf32>
    %c0_3 = arith.constant 0 : index
    %c0_4 = arith.constant 0 : index
    %17 = vector.load %arg3[%c0_3, %c0_4] : memref<32x128xf32, #tpu.memory_space<vmem>>, vector<32x128xf32>
    %cst_5 = arith.constant dense<0.000000e+00> : vector<256x128xf32>
    %18 = tpu.matmul %7, %17, %cst_5 {dimension_numbers = #tpu.dot_dimension_numbers<[1], [0], [0], [1], [0, 0, 1, 1], [], []>} : vector<256x32xf32>, vector<32x128xf32>, vector<256x128xf32> -> vector<256x128xf32>
    %19 = arith.addf %16, %18 : vector<256x128xf32>
    %c0_6 = arith.constant 0 : index
    %c0_7 = arith.constant 0 : index
    %20 = vector.load %arg4[%c0_6, %c0_7] : memref<8x128xf32, #tpu.memory_space<vmem>>, vector<8x128xf32>
    %cst_8 = arith.constant dense<0.000000e+00> : vector<256x128xf32>
    %21 = tpu.matmul %14, %20, %cst_8 {dimension_numbers = #tpu.dot_dimension_numbers<[1], [0], [0], [1], [0, 0, 1, 1], [], []>} : vector<256x8xf32>, vector<8x128xf32>, vector<256x128xf32> -> vector<256x128xf32>
    %22 = arith.addf %19, %21 : vector<256x128xf32>
    %c0_9 = arith.constant 0 : index
    %c0_10 = arith.constant 0 : index
    %23 = vector.load %arg5[%c0_9, %c0_10] : memref<1x128xf32, #tpu.memory_space<vmem>>, vector<1x128xf32>
    %24 = vector.broadcast %23 : vector<1x128xf32> to vector<256x128xf32>
    %25 = arith.addf %22, %24 : vector<256x128xf32>
    %c0_11 = arith.constant 0 : index
    %c0_12 = arith.constant 0 : index
    %26 = vector.load %arg6[%c0_11, %c0_12] : memref<256x128xf32, #tpu.memory_space<vmem>>, vector<256x128xf32>
    tpu.vector_store %arg6[%c0_11, %c0_12], %25 {strides = array<i32>} : memref<256x128xf32, #tpu.memory_space<vmem>>, vector<256x128xf32>,
    return
  }
  func.func @transform_0(%arg0: i32) -> (i32, i32) {
    %c0_i32 = arith.constant 0 : i32
    %c0_i32_0 = arith.constant 0 : i32
    return %arg0, %c0_i32 : i32, i32
  }
  func.func @transform_1(%arg0: i32) -> (i32, i32) {
    %c0_i32 = arith.constant 0 : i32
    %c0_i32_0 = arith.constant 0 : i32
    %c0_i32_1 = arith.constant 0 : i32
    return %c0_i32, %c0_i32_0 : i32, i32
  }
  func.func @transform_2(%arg0: i32) -> (i32, i32) {
    %c0_i32 = arith.constant 0 : i32
    %c0_i32_0 = arith.constant 0 : i32
    %c0_i32_1 = arith.constant 0 : i32
    return %c0_i32, %c0_i32_0 : i32, i32
  }
  func.func @transform_3(%arg0: i32) -> (i32, i32) {
    %c0_i32 = arith.constant 0 : i32
    %c0_i32_0 = arith.constant 0 : i32
    %c0_i32_1 = arith.constant 0 : i32
    return %c0_i32, %c0_i32_0 : i32, i32
  }
  func.func @transform_4(%arg0: i32) -> (i32, i32) {
    %c0_i32 = arith.constant 0 : i32
    %c0_i32_0 = arith.constant 0 : i32
    %c0_i32_1 = arith.constant 0 : i32
    return %c0_i32, %c0_i32_0 : i32, i32
  }
  func.func @transform_5(%arg0: i32) -> (i32, i32) {
    %c0_i32 = arith.constant 0 : i32
    %c0_i32_0 = arith.constant 0 : i32
    return %arg0, %c0_i32 : i32, i32
  }
}

</mosaic_0001>

<bundles_post_ra>
// kernel: forward.1
= control target key start
LH: loop header
LB: loop body
LE: loop exit
PB: predicated region body
PF: predicated region fallthrough
CT: control target
= control target key end

     0   :  { %s1452_s22 = smov 96   ;;  %s2521_s0 = inlined_call_operand.vmem [shape: f32[256,128], index: 0, kind: input, shape index: {}]   ;;  %s2522_s1 = inlined_call_operand.vmem [shape: f32[128,128], index: 1, kind: input, shape index: {}]   ;;  %s2523_s2 = inlined_call_operand.vmem [shape: f32[32,128], index: 2, kind: input, shape index: {}]   ;;  %s2524_s3 = inlined_call_operand.vmem [shape: f32[8,128], index: 3, kind: input, shape index: {}]   ;;  %s2525_s4 = inlined_call_operand.vmem [shape: f32[1,128], index: 4, kind: input, shape index: {}]   ;;  %s2526_s5 = inlined_call_operand.hbm [shape: f32[256,128], index: 5, kind: output, shape index: {}]  }
   0x1   :  { %v1492_v0 = vld [vmem:[%s2521_s0 + $0x10] sm:$0xff]  ;;  %v1497_v1 = vld [vmem:[%s2521_s0] sm:$0xff] }
   0x2   :  { %89 = vrot.lane.b32.xlu1 %v1492_v0, %s1452_s22  ;;  %85 = vrot.lane.b32.xlu0 %v1497_v1, %s1452_s22  ;;  %v1506_v2 = vld [vmem:[%s2521_s0 + $0x20] sm:$0xff] }
   0x3   :  { %93 = vrot.lane.b32.xlu2 %v1506_v2, %s1452_s22 }
   0x4   :  { %10 = vsyncpa [#allocation3], 0  ;;  %v1513_v3 = vld [vmem:[%s2521_s0 + $0x18] sm:$0xff]  ;;  %v1518_v4 = vld [vmem:[%s2521_s0 + $0x8] sm:$0xff]  ;;  %s1453_s18 = smov 64   ;;  %vm713_vm0 = vcmask 261120  }
   0x5   :  { %v1523_v5 = vld [vmem:[%s2521_s0 + $0x28] sm:$0xff]  ;;  %v1534_v6 = vld [vmem:[%s2521_s0 + $0x30] sm:$0xff]  ;;  %v1539_v7 = vld [vmem:[%s2521_s0 + $0x38] sm:$0xff]  ;;  %s1455_s23 = smov 112   ;;  %vm1005_vm1 = vcmask 64512   ;;  %s1321_s8 = sshll.u32 %s2526_s5, 4  ;;  %s1322_s8 = int_to_ptr.hbm [resolvable:$true] %s1321_s8 }
   0x6   :  { %v1548_v8 = vld [vmem:[%s2521_s0 + $0x40] sm:$0xff]  ;;  %v1555_v9 = vld [vmem:[%s2521_s0 + $0x48] sm:$0xff]  ;;  %v1560_v10 = vld [vmem:[%s2521_s0 + $0x50] sm:$0xff]  ;;  %s1457_s9 = smov 128   ;;  %s1458_s10 = smov 8  }
   0x7   :  { %v1565_v11 = vld [vmem:[%s2521_s0 + $0xc8] sm:$0xff]  ;;  %v1576_v12 = vld [vmem:[%s2521_s0 + $0x58] sm:$0xff]  ;;  %v1581_v13 = vld [vmem:[%s2521_s0 + $0x70] sm:$0xff] }
   0x8   :  { %2532 = vst [vmem:[#allocation5_spill] sm:$0xff] %v1565_v11  ;;  %v1586_v14 = vld [vmem:[%s2521_s0 + $0x78] sm:$0xff]  ;;  %v1597_v15 = vld [vmem:[%s2521_s0 + $0x60] sm:$0xff]  ;;  %v1607_v17 = vld [vmem:[%s2521_s0 + $0xe8] sm:$0xff] }
   0x9   :  { %v1602_v16 = vld [vmem:[%s2521_s0 + $0xd8] sm:$0xff]  ;;  %v1618_v18 = vld [vmem:[%s2521_s0 + $0x68] sm:$0xff]  ;;  %v1623_v19 = vld [vmem:[%s2521_s0 + $0x80] sm:$0xff] }
   0xa   :  { %91 = vrot.lane.b32.xlu1 %v1513_v3, %s1452_s22  ;;  %87 = vrot.lane.b32.xlu0 %v1518_v4, %s1452_s22  ;;  %v1628_v20 = vld [vmem:[%s2521_s0 + $0x90] sm:$0xff]  ;;  %v1653_v23 = vld [vmem:[%s2521_s0 + $0x98] sm:$0xff] }
   0xb   :  { %95 = vrot.lane.b32.xlu2 %v1523_v5, %s1452_s22  ;;  %v1639_v21 = vld [vmem:[%s2521_s0 + $0xf0] sm:$0xff]  ;;  %v1673_v33 = vld [vmem:[%s2521_s0 + $0xe0] sm:$0xff]  ;;  %v1690_v38 = vld [vmem:[%s2521_s0 + $0x88] sm:$0xff] }
   0xc   :  { %2533 = vst [vmem:[#allocation6_spill] sm:$0xff] %v1639_v21  ;;  %v1644_v22 = vld [vmem:[%s2521_s0 + $0xd0] sm:$0xff]  ;;  %v1732_v50 = vld [vmem:[%s2522_s1 + $0x78] sm:$0xff]  ;;  %v706_v52 = vld [vmem:[%s2522_s1 + $0x68] sm:$0xff] }
   0xd   :  { %v1737_v51 = vld [vmem:[%s2522_s1 + $0x70] sm:$0xff]  ;;  %891 = vmatpush.msra.mxu1 %v1732_v50  ;;  %v705_v53 = vld [vmem:[%s2522_s1 + $0x60] sm:$0xff]  ;;  %v704_v56 = vld [vmem:[%s2522_s1 + $0x58] sm:$0xff] }
   0xe   :  { %v703_v57 = vld [vmem:[%s2522_s1 + $0x50] sm:$0xff]  ;;  %v702_v58 = vld [vmem:[%s2522_s1 + $0x48] sm:$0xff] }
   0xf   :  { %892 = vmatpush.msra.mxu1 %v1737_v51 }
  0x11   :  { %893 = vmatpush.msra.mxu1 %v706_v52 }
  0x12   :  { %97 = vrot.lane.b32.xlu1 %v1534_v6, %s1452_s22  ;;  %99 = vrot.lane.b32.xlu0 %v1539_v7, %s1452_s22 }
  0x13   :  { %101 = vrot.lane.b32.xlu2 %v1548_v8, %s1452_s22  ;;  %894 = vmatpush.msra.mxu1 %v705_v53 }
  0x15   :  { %895 = vmatpush.msra.mxu1 %v704_v56 }
  0x17   :  { %896 = vmatpush.msra.mxu1 %v703_v57 }
  0x19   :  { %897 = vmatpush.msra.mxu1 %v702_v58 }
  0x1a   :  { %103 = vrot.lane.b32.xlu1 %v1555_v9, %s1452_s22  ;;  %105 = vrot.lane.b32.xlu0 %v1560_v10, %s1452_s22 }
  0x1b   :  { %135 = vrot.lane.b32.xlu2 %v1565_v11, %s1452_s22 }
  0x22   :  { %107 = vrot.lane.b32.xlu0 %v1576_v12, %s1452_s22  ;;  %113 = vrot.lane.b32.xlu1 %v1581_v13, %s1452_s22 }
  0x23   :  { %115 = vrot.lane.b32.xlu2 %v1586_v14, %s1452_s22 }
  0x2a   :  { %109 = vrot.lane.b32.xlu0 %v1597_v15, %s1452_s22  ;;  %139 = vrot.lane.b32.xlu1 %v1602_v16, %s1452_s22 }
  0x2b   :  { %143 = vrot.lane.b32.xlu2 %v1607_v17, %s1452_s22 }
  0x32   :  { %111 = vrot.lane.b32.xlu0 %v1618_v18, %s1452_s22  ;;  %117 = vrot.lane.b32.xlu1 %v1623_v19, %s1452_s22 }
  0x33   :  { %121 = vrot.lane.b32.xlu2 %v1628_v20, %s1452_s22 }
  0x3a   :  { %145 = vrot.lane.b32.xlu1 %v1639_v21, %s1452_s22  ;;  %137 = vrot.lane.b32.xlu0 %v1644_v22, %s1452_s22  ;;  %v693_v21 = vld [vmem:[%s2522_s1] sm:$0xff] }
  0x3b   :  { %123 = vrot.lane.b32.xlu2 %v1653_v23, %s1452_s22 }
  0x5d   :  { %v94_v24 = vpop.permute.xlu2 %93 }
  0x5e   :  { %v1685_v35 = vmax.f32 %v1506_v2, %v94_v24 }
  0x65   :  { %v96_v29 = vpop.permute.xlu2 %95 }
  0x66   :  { %v1668_v30 = vmax.f32 %v1523_v5, %v96_v29  ;;  %v1786_v29 = vld [vmem:[%s2521_s0 + $0xf8] sm:$0xff] }
  0x67   :  { %2534 = vst [vmem:[#allocation7_spill] sm:$0xff] %v1786_v29 }
  0x6d   :  { %v102_v45 = vpop.permute.xlu2 %101 }
  0x6e   :  { %v1720_v47 = vmax.f32 %v1548_v8, %v102_v45  ;;  %v696_v45 = vld [vmem:[%s2522_s1 + $0x18] sm:$0xff] }
  0x74   :  { %v90_v25 = vpop.permute.xlu1 %89  ;;  %v86_v26 = vpop.permute.xlu0 %85 }
  0x75   :  { %v1658_v27 = vmax.f32 %v1492_v0, %v90_v25  ;;  %v1661_v28 = vmax.f32 %v1497_v1, %v86_v26  ;;  %v136_v61 = vpop.permute.xlu2 %135  ;;  %v701_v26 = vld [vmem:[%s2522_s1 + $0x40] sm:$0xff] }
  0x76   :  { %v1769_v62 = vmax.f32 %v1565_v11, %v136_v61  ;;  %898 = vmatpush.msra.mxu1 %v701_v26  ;;  %v710_v61 = vld [vmem:[%s2523_s2 + $0x8] sm:$0xff] }
  0x77   :  { %249 = vrot.lane.b32.xlu1 %v1658_v27, %s1453_s18  ;;  %245 = vrot.lane.b32.xlu0 %v1661_v28, %s1453_s18 }
  0x7c   :  { %v92_v31 = vpop.permute.xlu1 %91  ;;  %v88_v32 = vpop.permute.xlu0 %87 }
  0x7d   :  { %v1676_v34 = vmax.f32 %v1518_v4, %v88_v32  ;;  %v1702_v40 = vmax.f32 %v1513_v3, %v92_v31  ;;  %v1773_v24 = vpop.permute.xlu2 %115  ;;  %v700_v31 = vld [vmem:[%s2522_s1 + $0x38] sm:$0xff] }
  0x7e   :  { %899 = vmatpush.msra.mxu1 %v700_v31 }
  0x7f   :  { %255 = vrot.lane.b32.xlu1 %v1668_v30, %s1453_s18  ;;  %141 = vrot.lane.b32.xlu0 %v1673_v33, %s1452_s22 }
  0x80   :  { %247 = vrot.lane.b32.xlu2 %v1676_v34, %s1453_s18 }
  0x84   :  { %v98_v36 = vpop.permute.xlu1 %97  ;;  %v100_v37 = vpop.permute.xlu0 %99 }
  0x85   :  { %v1693_v39 = vmax.f32 %v1534_v6, %v98_v36  ;;  %v1705_v41 = vmax.f32 %v1539_v7, %v100_v37  ;;  %v1791_v32 = vpop.permute.xlu2 %143  ;;  %v699_v36 = vld [vmem:[%s2522_s1 + $0x30] sm:$0xff]  ;;  %v698_v37 = vld [vmem:[%s2522_s1 + $0x28] sm:$0xff] }
  0x86   :  { %900 = vmatpush.msra.mxu1 %v699_v36 }
  0x87   :  { %257 = vrot.lane.b32.xlu1 %v1693_v39, %s1453_s18  ;;  %119 = vrot.lane.b32.xlu0 %v1690_v38, %s1452_s22 }
  0x88   :  { %253 = vrot.lane.b32.xlu2 %v1685_v35, %s1453_s18  ;;  %901 = vmatpush.msra.mxu1 %v698_v37 }
  0x8c   :  { %v104_v42 = vpop.permute.xlu1 %103  ;;  %v106_v43 = vpop.permute.xlu0 %105 }
  0x8d   :  { %v1708_v44 = vmax.f32 %v1555_v9, %v104_v42  ;;  %v1717_v46 = vmax.f32 %v1560_v10, %v106_v43  ;;  %v697_v42 = vld [vmem:[%s2522_s1 + $0x20] sm:$0xff]  ;;  %v712_v43 = vld [vmem:[%s2523_s2 + $0x18] sm:$0xff] }
  0x8e   :  { %902 = vmatpush.msra.mxu1 %v697_v42  ;;  %790 = vmatpush.msra.mxu0 %v712_v43 }
  0x8f   :  { %251 = vrot.lane.b32.xlu0 %v1702_v40, %s1453_s18  ;;  %259 = vrot.lane.b32.xlu1 %v1705_v41, %s1453_s18 }
  0x90   :  { %263 = vrot.lane.b32.xlu2 %v1708_v44, %s1453_s18  ;;  %903 = vmatpush.msra.mxu1 %v696_v45 }
  0x91   :  { %1397 = vmatpush.msra.mxu3 %v712_v43 }
  0x94   :  { %v108_v48 = vpop.permute.xlu0 %107  ;;  %v114_v63 = vpop.permute.xlu1 %113 }
  0x95   :  { %v1723_v49 = vmax.f32 %v1576_v12, %v108_v48  ;;  %v1776_v25 = vmax.f32 %v1581_v13, %v114_v63  ;;  %v711_v48 = vld [vmem:[%s2523_s2 + $0x10] sm:$0xff]  ;;  %v694_v63 = vld [vmem:[%s2522_s1 + $0x8] sm:$0xff] }
  0x96   :  { %791 = vmatpush.msra.mxu0 %v711_v48  ;;  %1398 = vmatpush.msra.mxu3 %v711_v48 }
  0x97   :  { %261 = vrot.lane.b32.xlu1 %v1720_v47, %s1453_s18  ;;  %265 = vrot.lane.b32.xlu0 %v1717_v46, %s1453_s18 }
  0x98   :  { %267 = vrot.lane.b32.xlu2 %v1723_v49, %s1453_s18  ;;  %792 = vmatpush.msra.mxu0 %v710_v61 }
  0x99   :  { %1399 = vmatpush.msra.mxu3 %v710_v61 }
  0x9c   :  { %v110_v54 = vpop.permute.xlu0 %109  ;;  %v1824_v11 = vpop.permute.xlu1 %139 }
  0x9d   :  { %v1750_v55 = vmax.f32 %v1597_v15, %v110_v54  ;;  %v1813_v54 = vpop.permute.xlu2 %121 }
  0x9f   :  { %269 = vrot.lane.b32.xlu1 %v1750_v55, %s1453_s18 }
  0xa4   :  { %v112_v59 = vpop.permute.xlu0 %111  ;;  %v1837_v48 = vpop.permute.xlu1 %117 }
  0xa5   :  { %v1764_v60 = vmax.f32 %v1618_v18, %v112_v59  ;;  %v695_v59 = vld [vmem:[%s2522_s1 + $0x10] sm:$0xff]  ;;  %v1834_v43 = vpop.permute.xlu2 %123  ;;  %s1454_s1 = smov 120  }
  0xa6   :  { %904 = vmatpush.msra.mxu1 %v695_v59 }
  0xa7   :  { %271 = vrot.lane.b32.xlu0 %v1764_v60, %s1453_s18  ;;  %147 = vrot.lane.b32.xlu1 %v1786_v29, %s1452_s22  ;;  %v709_v29 = vld [vmem:[%s2523_s2] sm:$0xff] }
  0xa8   :  { %905 = vmatpush.msra.mxu1 %v694_v63  ;;  %793 = vmatpush.msra.mxu0 %v709_v29 }
  0xa9   :  { %1400 = vmatpush.msra.mxu3 %v709_v29 }
  0xaa   :  { %906 = vmatpush.msra.mxu1 %v693_v21 }
  0xab   :  { %907 = vmatmul.f32.vlgmr.msra.gmra.mxu1 %v1497_v1  ;;  %1401 = vmatpush.msrb.mxu3 %v1732_v50 }
  0xac   :  { %v1841_v1 = vpop.permute.xlu1 %145  ;;  %v138_v50 = vpop.permute.xlu0 %137 }
  0xad   :  { %1402 = vmatpush.msrb.mxu3 %v1737_v51 }
  0xaf   :  { %295 = vrot.lane.b32.xlu0 %v1769_v62, %s1453_s18  ;;  %1403 = vmatpush.msrb.mxu3 %v706_v52 }
  0xb1   :  { %1404 = vmatpush.msrb.mxu3 %v705_v53 }
  0xb3   :  { %910 = vmatmul.f32.gmra.mxu1 %v1518_v4  ;;  %1405 = vmatpush.msrb.mxu3 %v704_v56 }
  0xb5   :  { %1406 = vmatpush.msrb.mxu3 %v703_v57 }
  0xb7   :  { %273 = vrot.lane.b32.xlu0 %v1776_v25, %s1453_s18  ;;  %1407 = vmatpush.msrb.mxu3 %v702_v58 }
  0xb9   :  { %1408 = vmatpush.msrb.mxu3 %v701_v26  ;;  %v1922_v26 = vld [vmem:[%s2521_s0 + $0xa8] sm:$0xff] }
  0xbb   :  { %913 = vmatmul.f32.gmra.mxu1 %v1492_v0  ;;  %1409 = vmatpush.msrb.mxu3 %v700_v31 }
  0xbd   :  { %1410 = vmatpush.msrb.mxu3 %v699_v36 }
  0xbf   :  { %1411 = vmatpush.msrb.mxu3 %v698_v37 }
  0xc1   :  { %1412 = vmatpush.msrb.mxu3 %v697_v42 }
  0xc3   :  { %916 = vmatmul.f32.gmra.mxu1 %v1513_v3  ;;  %1413 = vmatpush.msrb.mxu3 %v696_v45 }
  0xc5   :  { %1414 = vmatpush.msrb.mxu3 %v695_v59  ;;  %v2023_v59 = vmax.f32 %v1623_v19, %v1837_v48 }
  0xc7   :  { %1415 = vmatpush.msrb.mxu3 %v694_v63 }
  0xc9   :  { %1416 = vmatpush.msrb.mxu3 %v693_v21  ;;  %v1883_v21 = vld [vmem:[%s2521_s0 + $0xa0] sm:$0xff] }
  0xcb   :  { %919 = vmatmul.f32.gmra.mxu1 %v1506_v2 }
  0xd3   :  { %922 = vmatmul.f32.gmra.mxu1 %v1523_v5 }
  0xda   :  { %v248_v61 = vpop.permute.xlu2 %247 }
  0xdb   :  { %v1858_v53 = vmax.f32 %v1676_v34, %v248_v61  ;;  %925 = vmatmul.f32.gmra.mxu1 %v1534_v6  ;;  %v2032_v61 = vmax.f32 %v1607_v17, %v1791_v32 }
  0xe2   :  { %v254_v29 = vpop.permute.xlu2 %253 }
  0xe3   :  { %v1844_v51 = vmax.f32 %v1685_v35, %v254_v29  ;;  %928 = vmatmul.f32.gmra.mxu1 %v1539_v7 }
  0xe5   :  { %413 = vrot.lane.b32.xlu1 %v1844_v51, %s1454_s1 }
  0xe9   :  { %v250_v0 = vpop.permute.xlu1 %249  ;;  %v246_v4 = vpop.permute.xlu0 %245 }
  0xea   :  { %v1850_v52 = vmax.f32 %v1661_v28, %v246_v4  ;;  %v1868_v57 = vmax.f32 %v1658_v27, %v250_v0  ;;  %v2054_v4 = vmax.f32 %v1628_v20, %v1813_v54 }
  0xeb   :  { %931 = vmatmul.f32.gmra.mxu1 %v1548_v8  ;;  %v264_v8 = vpop.permute.xlu2 %263 }
  0xec   :  { %405 = vrot.lane.b32.xlu2 %v1850_v52, %s1454_s1  ;;  %1333 = vmatmul.msk.f32.vlgmr.msra.gmra.mxu0 %vm713_vm0, %v1850_v52 }
  0xf1   :  { %v256_v35 = vpop.permute.xlu1 %255  ;;  %v142_v3 = vpop.permute.xlu0 %141 }
  0xf2   :  { %v1899_v58 = vmax.f32 %v1668_v30, %v256_v35  ;;  %v1937_v31 = vmax.f32 %v1673_v33, %v142_v3 }
  0xf3   :  { %934 = vmatmul.f32.gmra.mxu1 %v1555_v9 }
  0xf4   :  { %407 = vrot.lane.b32.xlu2 %v1858_v53, %s1454_s1  ;;  %1334 = vmatmul.msk.f32.gmra.mxu0 %vm713_vm0, %v1858_v53 }
  0xf9   :  { %v258_v28 = vpop.permute.xlu1 %257  ;;  %v1865_v56 = vpop.permute.xlu0 %119 }
  0xfa   :  { %v1871_v2 = vmax.f32 %v1693_v39, %v258_v28  ;;  %v1896_v39 = vmax.f32 %v1644_v22, %v138_v50  ;;  %v2041_v50 = vld [vmem:[%s2521_s0 + $0xb8] sm:$0xff] }
  0xfb   :  { %937 = vmatmul.f32.gmra.mxu1 %v1560_v10  ;;  %v268_v10 = vpop.permute.xlu2 %267 }
  0xfc   :  { %417 = vrot.lane.b32.xlu1 %v1871_v2, %s1454_s1  ;;  %409 = vrot.lane.b32.xlu2 %v1868_v57, %s1454_s1 }
  0xfd   :  { %1335 = vmatmul.msk.f32.gmra.mxu0 %vm713_vm0, %v1868_v57 }
 0x101   :  { %v252_v5 = vpop.permute.xlu0 %251  ;;  %v260_v34 = vpop.permute.xlu1 %259 }
 0x102   :  { %v1886_v27 = vmax.f32 %v1702_v40, %v252_v5  ;;  %v1914_v30 = vmax.f32 %v1705_v41, %v260_v34 }
 0x103   :  { %940 = vmatmul.f32.gmra.mxu1 %v1576_v12 }
 0x104   :  { %125 = vrot.lane.b32.xlu2 %v1883_v21, %s1452_s22  ;;  %411 = vrot.lane.b32.xlu0 %v1886_v27, %s1454_s1 }
 0x105   :  { %1336 = vmatmul.msk.f32.gmra.mxu0 %vm713_vm0, %v1886_v27 }
 0x109   :  { %v266_v6 = vpop.permute.xlu0 %265  ;;  %v262_v7 = vpop.permute.xlu1 %261 }
 0x10a   :  { %v1902_v40 = vmax.f32 %v1717_v46, %v266_v6  ;;  %v1917_v46 = vmax.f32 %v1720_v47, %v262_v7  ;;  %v1934_v47 = vmax.f32 %v1708_v44, %v264_v8  ;;  %v1964_v44 = vmax.f32 %v1723_v49, %v268_v10 }
 0x10b   :  { %943 = vmatmul.f32.gmra.mxu1 %v1597_v15  ;;  %v1982_v49 = vmax.f32 %v1586_v14, %v1773_v24 }
 0x10c   :  { %415 = vrot.lane.b32.xlu2 %v1899_v58, %s1454_s1  ;;  %297 = vrot.lane.b32.xlu0 %v1896_v39, %s1453_s18 }
 0x10d   :  { %1337 = vmatmul.msk.f32.gmra.mxu0 %vm713_vm0, %v1844_v51  ;;  %425 = vrot.lane.b32.xlu1 %v1902_v40, %s1454_s1 }
 0x113   :  { %946 = vmatmul.f32.gmra.mxu1 %v1618_v18 }
 0x114   :  { %421 = vrot.lane.b32.xlu2 %v1917_v46, %s1454_s1  ;;  %419 = vrot.lane.b32.xlu0 %v1914_v30, %s1454_s1 }
 0x115   :  { %1338 = vmatmul.msk.f32.gmra.mxu0 %vm713_vm0, %v1899_v58  ;;  %127 = vrot.lane.b32.xlu1 %v1922_v26, %s1452_s22 }
 0x119   :  { %v272_v41 = vpop.permute.xlu0 %271 }
 0x11b   :  { %949 = vmatmul.f32.gmra.mxu1 %v1581_v13 }
 0x11c   :  { %423 = vrot.lane.b32.xlu2 %v1934_v47, %s1454_s1 }
 0x11d   :  { %1339 = vmatmul.msk.f32.gmra.mxu0 %vm713_vm0, %v1871_v2  ;;  %301 = vrot.lane.b32.xlu1 %v1937_v31, %s1453_s18 }
 0x121   :  { %v296_v9 = vpop.permute.xlu0 %295 }
 0x122   :  { %v1947_v36 = vmax.f32 %v1769_v62, %v296_v9  ;;  %v270_v62 = vpop.permute.xlu1 %269 }
 0x123   :  { %952 = vmatmul.f32.gmra.mxu1 %v1586_v14  ;;  %v1975_v18 = vmax.f32 %v1750_v55, %v270_v62  ;;  %v1992_v55 = vmax.f32 %v1764_v60, %v272_v41  ;;  %v1999_v14 = vmax.f32 %v1602_v16, %v1824_v11  ;;  %v2018_v11 = vld [vmem:[%s2521_s0 + $0xb0] sm:$0xff] }
 0x124   :  { %1358 = vmatmul.msk.f32.vlgmr.msra.gmra.mxu3 %vm713_vm0, %v1947_v36 }
 0x125   :  { %1340 = vmatmul.msk.f32.gmra.mxu0 %vm713_vm0, %v1914_v30 }
 0x129   :  { %v274_v45 = vpop.permute.xlu0 %273 }
 0x12a   :  { %v2011_v60 = vmax.f32 %v1776_v25, %v274_v45  ;;  %v148_v25 = vpop.permute.xlu1 %147 }
 0x12b   :  { %955 = vmatmul.f32.gmra.mxu1 %v1623_v19 }
 0x12d   :  { %1341 = vmatmul.msk.f32.gmra.mxu0 %vm713_vm0, %v1917_v46 }
 0x133   :  { %958 = vmatmul.f32.gmra.mxu1 %v1690_v38 }
 0x135   :  { %1342 = vmatmul.msk.f32.gmra.mxu0 %vm713_vm0, %v1934_v47 }
 0x13b   :  { %961 = vmatmul.f32.gmra.mxu1 %v1628_v20 }
 0x13d   :  { %1343 = vmatmul.msk.f32.gmra.mxu0 %vm713_vm0, %v1902_v40 }
 0x143   :  { %964 = vmatmul.f32.gmra.mxu1 %v1653_v23 }
 0x145   :  { %1344 = vmatmul.msk.f32.gmra.mxu0 %vm713_vm0, %v1964_v44 }
 0x146   :  { %v406_v12 = vpop.permute.xlu2 %405 }
 0x147   :  { %v1970_v15 = vmax.f32 %v1850_v52, %v406_v12 }
 0x149   :  { %565 = vrot.lane.b32.xlu0 %v1970_v15, %s1455_s23 }
 0x14b   :  { %967 = vmatmul.f32.gmra.mxu1 %v1883_v21 }
 0x14d   :  { %1345 = vmatmul.msk.f32.gmra.mxu0 %vm713_vm0, %v1975_v18 }
 0x14e   :  { %v408_v13 = vpop.permute.xlu2 %407 }
 0x14f   :  { %v1985_v37 = vmax.f32 %v1858_v53, %v408_v13  ;;  %v2535_v53 = vld [vmem:[#allocation6_spill] sm:$0xff] }
 0x150   :  { %v2070_v20 = vmax.f32 %v2535_v53, %v1841_v1  ;;  %v2088_v1 = vmax.f32 %v1653_v23, %v1834_v43 }
 0x151   :  { %567 = vrot.lane.b32.xlu2 %v1985_v37, %s1455_s23  ;;  %275 = vrot.lane.b32.xlu0 %v1982_v49, %s1453_s18 }
 0x153   :  { %970 = vmatmul.f32.gmra.mxu1 %v1922_v26 }
 0x155   :  { %1346 = vmatmul.msk.f32.gmra.mxu0 %vm713_vm0, %v1992_v55 }
 0x156   :  { %v410_v42 = vpop.permute.xlu2 %409 }
 0x157   :  { %v2002_v24 = vmax.f32 %v1868_v57, %v410_v42  ;;  %v414_v19 = vpop.permute.xlu1 %413 }
 0x158   :  { %v2076_v28 = vmax.f32 %v1844_v51, %v414_v19 }
 0x159   :  { %299 = vrot.lane.b32.xlu2 %v1999_v14, %s1453_s18  ;;  %427 = vrot.lane.b32.xlu0 %v1964_v44, %s1454_s1 }
 0x15a   :  { %569 = vrot.lane.b32.xlu1 %v2002_v24, %s1455_s23 }
 0x15d   :  { %1347 = vmatmul.msk.f32.gmra.mxu0 %vm713_vm0, %v2011_v60 }
 0x15e   :  { %v126_v63 = vpop.permute.xlu2 %125 }
 0x15f   :  { %v2104_v23 = vmax.f32 %v1883_v21, %v126_v63 }
 0x161   :  { %277 = vrot.lane.b32.xlu2 %v2023_v59, %s1453_s18  ;;  %129 = vrot.lane.b32.xlu0 %v2018_v11, %s1452_s22 }
 0x166   :  { %v416_v48 = vpop.permute.xlu2 %415 }
 0x167   :  { %v2045_v29 = vmax.f32 %v1899_v58, %v416_v48  ;;  %v2136_v58 = vld [vmem:[%s2521_s0 + $0xc0] sm:$0xff] }
 0x169   :  { %429 = vrot.lane.b32.xlu2 %v1975_v18, %s1454_s1  ;;  %303 = vrot.lane.b32.xlu0 %v2032_v61, %s1453_s18 }
 0x16e   :  { %v418_v32 = vpop.permute.xlu1 %417  ;;  %v422_v57 = vpop.permute.xlu2 %421 }
 0x16f   :  { %v2057_v52 = vmax.f32 %v1871_v2, %v418_v32  ;;  %v2091_v51 = vmax.f32 %v1917_v46, %v422_v57  ;;  %v2095_v2 = vmax.f32 %v1690_v38, %v1865_v56 }
 0x171   :  { %131 = vrot.lane.b32.xlu2 %v2041_v50, %s1452_s22  ;;  %575 = vrot.lane.b32.xlu0 %v2045_v29, %s1455_s23 }
 0x176   :  { %v412_v0 = vpop.permute.xlu0 %411 }
 0x177   :  { %v2060_v35 = vmax.f32 %v1886_v27, %v412_v0  ;;  %v424_v27 = vpop.permute.xlu2 %423 }
 0x178   :  { %v2107_v43 = vmax.f32 %v1934_v47, %v424_v27 }
 0x179   :  { %577 = vrot.lane.b32.xlu2 %v2057_v52, %s1455_s23  ;;  %281 = vrot.lane.b32.xlu0 %v2054_v4, %s1453_s18 }
 0x17a   :  { %571 = vrot.lane.b32.xlu1 %v2060_v35, %s1455_s23 }
 0x17e   :  { %v298_v3 = vpop.permute.xlu0 %297 }
 0x17f   :  { %v2073_v54 = vmax.f32 %v1896_v39, %v298_v3  ;;  %v426_v5 = vpop.permute.xlu1 %425  ;;  %v1004_v39 = vld [vmem:[%s2524_s3] sm:$0xff] }
 0x180   :  { %v2119_v21 = vmax.f32 %v1902_v40, %v426_v5  ;;  %1117 = vmatpush.msra.mxu2 %v1004_v39  ;;  %1417 = vmatpush.msra.mxu3 %v1004_v39  ;;  %v2536_v40 = vld [vmem:[#allocation7_spill] sm:$0xff] }
 0x181   :  { %305 = vrot.lane.b32.xlu2 %v2070_v20, %s1453_s18  ;;  %433 = vrot.lane.b32.xlu0 %v2011_v60, %s1454_s1  ;;  %v2141_v7 = vmax.f32 %v2536_v40, %v148_v25 }
 0x182   :  { %573 = vrot.lane.b32.xlu1 %v2076_v28, %s1455_s23  ;;  %1359 = vmatmul.msk.f32.gmra.mxu3 %vm713_vm0, %v2073_v54 }
 0x186   :  { %v420_v34 = vpop.permute.xlu0 %419 }
 0x187   :  { %v128_v38 = vpop.permute.xlu1 %127  ;;  %v2122_v6 = vmax.f32 %v1914_v30, %v420_v34 }
 0x188   :  { %v2116_v56 = vmax.f32 %v1922_v26, %v128_v38 }
 0x189   :  { %283 = vrot.lane.b32.xlu2 %v2088_v1, %s1453_s18  ;;  %581 = vrot.lane.b32.xlu0 %v2091_v51, %s1455_s23 }
 0x18a   :  { %279 = vrot.lane.b32.xlu1 %v2095_v2, %s1453_s18 }
 0x18f   :  { %v302_v8 = vpop.permute.xlu1 %301 }
 0x190   :  { %v2151_v9 = vmax.f32 %v1937_v31, %v302_v8 }
 0x191   :  { %583 = vrot.lane.b32.xlu2 %v2107_v43, %s1455_s23  ;;  %285 = vrot.lane.b32.xlu0 %v2104_v23, %s1453_s18 }
 0x192   :  { %431 = vrot.lane.b32.xlu1 %v1992_v55, %s1454_s1 }
 0x199   :  { %585 = vrot.lane.b32.xlu2 %v2119_v21, %s1455_s23  ;;  %287 = vrot.lane.b32.xlu0 %v2116_v56, %s1453_s18 }
 0x19a   :  { %579 = vrot.lane.b32.xlu1 %v2122_v6, %s1455_s23 }
 0x1a2   :  { %133 = vrot.lane.b32.xlu1 %v2136_v58, %s1452_s22 }
 0x1aa   :  { %307 = vrot.lane.b32.xlu1 %v2141_v7, %s1453_s18 }
 0x1ab   :  { %v568_v30 = vpop.permute.xlu2 %567 }
 0x1ac   :  { %v662_v13 = vmax.f32 %v1985_v37, %v568_v30 }
 0x1b3   :  { %v300_v46 = vpop.permute.xlu2 %299 }
 0x1b4   :  { %v2146_v26 = vmax.f32 %v1999_v14, %v300_v46 }
 0x1b6   :  { %1360 = vmatmul.msk.f32.gmra.mxu3 %vm713_vm0, %v2146_v26 }
 0x1bb   :  { %v278_v41 = vpop.permute.xlu2 %277  ;;  %v566_v47 = vpop.permute.xlu0 %565 }
 0x1bc   :  { %v661_v10 = vmax.f32 %v1970_v15, %v566_v47  ;;  %v2167_v15 = vmax.f32 %v2023_v59, %v278_v41 }
 0x1be   :  { %1361 = vmatmul.msk.f32.gmra.mxu3 %vm713_vm0, %v2151_v9  ;;  %1365 = vmatmul.msk.f32.vlgmr.msra.gmra.mxu2 %vm1005_vm1, %v661_v10 }
 0x1c3   :  { %v430_v12 = vpop.permute.xlu2 %429  ;;  %v276_v62 = vpop.permute.xlu0 %275 }
 0x1c4   :  { %v2159_v42 = vmax.f32 %v1982_v49, %v276_v62  ;;  %v2181_v25 = vmax.f32 %v1975_v18, %v430_v12 }
 0x1c6   :  { %1366 = vmatmul.msk.f32.gmra.mxu2 %vm1005_vm1, %v662_v13  ;;  %435 = vrot.lane.b32.xlu1 %v2159_v42, %s1454_s1 }
 0x1c7   :  { %1348 = vmatmul.msk.f32.gmra.mxu0 %vm713_vm0, %v2159_v42 }
 0x1cb   :  { %v428_v31 = vpop.permute.xlu0 %427  ;;  %v132_v37 = vpop.permute.xlu2 %131 }
 0x1cc   :  { %v570_v14 = vpop.permute.xlu1 %569  ;;  %v2170_v45 = vmax.f32 %v1964_v44, %v428_v31  ;;  %v2191_v63 = vmax.f32 %v2041_v50, %v132_v37  ;;  %v908_v37 = vpop.f32.mrf.mxu1 }
 0x1cd   :  { %v663_v49 = vmax.f32 %v2002_v24, %v570_v14 }
 0x1ce   :  { %437 = vrot.lane.b32.xlu1 %v2167_v15, %s1454_s1  ;;  %587 = vrot.lane.b32.xlu2 %v2170_v45, %s1455_s23 }
 0x1cf   :  { %1367 = vmatmul.msk.f32.gmra.mxu2 %vm1005_vm1, %v663_v49  ;;  %1349 = vmatmul.msk.f32.gmra.mxu0 %vm713_vm0, %v2167_v15  ;;  %v2537_v49 = vld [vmem:[#allocation5_spill] sm:$0xff] }
 0x1d3   :  { %v130_v59 = vpop.permute.xlu0 %129  ;;  %v578_v24 = vpop.permute.xlu2 %577 }
 0x1d4   :  { %v2184_v44 = vmax.f32 %v2018_v11, %v130_v59 }
 0x1d6   :  { %589 = vrot.lane.b32.xlu2 %v2181_v25, %s1455_s23  ;;  %289 = vrot.lane.b32.xlu0 %v2184_v44, %s1453_s18 }
 0x1db   :  { %v304_v19 = vpop.permute.xlu0 %303  ;;  %v306_v18 = vpop.permute.xlu2 %305 }
 0x1dc   :  { %v2194_v48 = vmax.f32 %v2032_v61, %v304_v19  ;;  %v2201_v32 = vmax.f32 %v2070_v20, %v306_v18 }
 0x1de   :  { %291 = vrot.lane.b32.xlu0 %v2191_v63, %s1453_s18  ;;  %1362 = vmatmul.msk.f32.gmra.mxu3 %vm713_vm0, %v2194_v48 }
 0x1e3   :  { %v576_v0 = vpop.permute.xlu0 %575  ;;  %v284_v46 = vpop.permute.xlu2 %283 }
 0x1e4   :  { %v666_v20 = vmax.f32 %v2045_v29, %v576_v0  ;;  %v2233_v8 = vmax.f32 %v2088_v1, %v284_v46  ;;  %v911_v0 = vpop.f32.mrf.mxu1 }
 0x1e6   :  { %1363 = vmatmul.msk.f32.gmra.mxu3 %vm713_vm0, %v2201_v32 }
 0x1eb   :  { %v282_v61 = vpop.permute.xlu0 %281  ;;  %v584_v10 = vpop.permute.xlu2 %583 }
 0x1ec   :  { %v572_v3 = vpop.permute.xlu1 %571 }
 0x1ed   :  { %v664_v57 = vmax.f32 %v2060_v35, %v572_v3 }
 0x1ef   :  { %1368 = vmatmul.msk.f32.gmra.mxu2 %vm1005_vm1, %v664_v57 }
 0x1f3   :  { %v434_v39 = vpop.permute.xlu0 %433  ;;  %v586_v31 = vpop.permute.xlu2 %585 }
 0x1f4   :  { %v574_v5 = vpop.permute.xlu1 %573 }
 0x1f5   :  { %v665_v27 = vmax.f32 %v2076_v28, %v574_v5  ;;  %v2219_v28 = vmax.f32 %v2054_v4, %v282_v61 }
 0x1f7   :  { %1369 = vmatmul.msk.f32.gmra.mxu2 %vm1005_vm1, %v665_v27 }
 0x1fb   :  { %v582_v29 = vpop.permute.xlu0 %581 }
 0x1fc   :  { %v280_v38 = vpop.permute.xlu1 %279 }
 0x1fd   :  { %v2210_v34 = vmax.f32 %v2095_v2, %v280_v38  ;;  %v667_v2 = vmax.f32 %v2057_v52, %v578_v24 }
 0x1ff   :  { %439 = vrot.lane.b32.xlu1 %v2210_v34, %s1454_s1  ;;  %1350 = vmatmul.msk.f32.gmra.mxu0 %vm713_vm0, %v2210_v34 }
 0x200   :  { %1370 = vmatmul.msk.f32.gmra.mxu2 %vm1005_vm1, %v666_v20 }
 0x203   :  { %v286_v41 = vpop.permute.xlu0 %285 }
 0x204   :  { %v432_v35 = vpop.permute.xlu1 %431 }
 0x205   :  { %v2222_v30 = vmax.f32 %v1992_v55, %v432_v35  ;;  %v2236_v55 = vmax.f32 %v2011_v60, %v434_v39  ;;  %v669_v60 = vmax.f32 %v2091_v51, %v582_v29  ;;  %v670_v51 = vmax.f32 %v2107_v43, %v584_v10  ;;  %v914_v39 = vpop.f32.mrf.mxu1 }
 0x206   :  { %v671_v43 = vmax.f32 %v2119_v21, %v586_v31 }
 0x207   :  { %591 = vrot.lane.b32.xlu2 %v2222_v30, %s1455_s23  ;;  %441 = vrot.lane.b32.xlu1 %v2219_v28, %s1454_s1 }
 0x208   :  { %1371 = vmatmul.msk.f32.gmra.mxu2 %vm1005_vm1, %v667_v2  ;;  %1351 = vmatmul.msk.f32.gmra.mxu0 %vm713_vm0, %v2219_v28 }
 0x20b   :  { %v288_v12 = vpop.permute.xlu0 %287 }
 0x20c   :  { %v580_v4 = vpop.permute.xlu1 %579 }
 0x20d   :  { %v668_v52 = vmax.f32 %v2122_v6, %v580_v4  ;;  %v2251_v6 = vmax.f32 %v2104_v23, %v286_v41  ;;  %v2265_v23 = vmax.f32 %v2116_v56, %v288_v12  ;;  %v917_v4 = vpop.f32.mrf.mxu1 }
 0x20f   :  { %443 = vrot.lane.b32.xlu1 %v2233_v8, %s1454_s1  ;;  %593 = vrot.lane.b32.xlu2 %v2236_v55, %s1455_s23 }
 0x210   :  { %1372 = vmatmul.msk.f32.gmra.mxu2 %vm1005_vm1, %v668_v52  ;;  %1352 = vmatmul.msk.f32.gmra.mxu0 %vm713_vm0, %v2233_v8 }
 0x214   :  { %v134_v47 = vpop.permute.xlu1 %133 }
 0x215   :  { %v2247_v1 = vmax.f32 %v2136_v58, %v134_v47  ;;  %v920_v41 = vpop.f32.mrf.mxu1 }
 0x217   :  { %293 = vrot.lane.b32.xlu0 %v2247_v1, %s1453_s18  ;;  %457 = vrot.lane.b32.xlu1 %v2073_v54, %s1454_s1 }
 0x218   :  { %1353 = vmatmul.msk.f32.gmra.mxu0 %vm713_vm0, %v2251_v6  ;;  %1373 = vmatmul.msk.f32.gmra.mxu2 %vm1005_vm1, %v669_v60 }
 0x21c   :  { %v308_v62 = vpop.permute.xlu1 %307 }
 0x21d   :  { %v2261_v13 = vmax.f32 %v2141_v7, %v308_v62 }
 0x21f   :  { %1364 = vmatmul.msk.f32.gmra.mxu3 %vm713_vm0, %v2261_v13  ;;  %459 = vrot.lane.b32.xlu1 %v2146_v26, %s1454_s1 }
 0x220   :  { %1374 = vmatmul.msk.f32.gmra.mxu2 %vm1005_vm1, %v670_v51  ;;  %445 = vrot.lane.b32.xlu0 %v2251_v6, %s1454_s1 }
 0x221   :  { %1354 = vmatmul.msk.f32.gmra.mxu0 %vm713_vm0, %v2265_v23 }
 0x227   :  { %973 = vmatmul.f32.vlgmr.msrb.gmra.mxu3 %v2018_v11  ;;  %461 = vrot.lane.b32.xlu1 %v2151_v9, %s1454_s1 }
 0x228   :  { %1375 = vmatmul.msk.f32.gmra.mxu2 %vm1005_vm1, %v671_v43  ;;  %447 = vrot.lane.b32.xlu0 %v2265_v23, %s1454_s1  ;;  %v588_v56 = vpop.permute.xlu2 %587 }
 0x229   :  { %v672_v7 = vmax.f32 %v2170_v45, %v588_v56 }
 0x22f   :  { %976 = vmatmul.f32.gmra.mxu3 %v2041_v50  ;;  %463 = vrot.lane.b32.xlu1 %v2194_v48, %s1454_s1  ;;  %v795_v50 = vpop.f32.mrf.mxu0 }
 0x230   :  { %1376 = vmatmul.msk.f32.gmra.mxu2 %vm1005_vm1, %v672_v7  ;;  %v590_v21 = vpop.permute.xlu2 %589 }
 0x231   :  { %v673_v11 = vmax.f32 %v2181_v25, %v590_v21  ;;  %v2304_v25 = vld [vmem:[%s2525_s4] ss:$0 sm:$0xff]  ;;  %s1456_s4 = smov [#allocation2]  }
 0x232   :  { %s1319_s22 = sshll.u32 %s1456_s4, 4  ;;  %s1320_s22 = int_to_ptr.vmem [resolvable:$true] %s1319_s22 }
 0x237   :  { %979 = vmatmul.f32.gmra.mxu3 %v2136_v58  ;;  %465 = vrot.lane.b32.xlu1 %v2201_v32, %s1454_s1  ;;  %v909_v58 = vadd.f32 %v908_v37, %v795_v50  ;;  %v798_v18 = vpop.f32.mrf.mxu0 }
 0x238   :  { %1377 = vmatmul.msk.f32.gmra.mxu2 %vm1005_vm1, %v673_v11  ;;  %v436_v14 = vpop.permute.xlu1 %435  ;;  %v912_v57 = vadd.f32 %v911_v0, %v798_v18 }
 0x239   :  { %v2294_v45 = vmax.f32 %v2159_v42, %v436_v14 }
 0x23b   :  { %595 = vrot.lane.b32.xlu2 %v2294_v45, %s1455_s23 }
 0x23f   :  { %982 = vmatmul.f32.gmra.mxu3 %v2537_v49  ;;  %467 = vrot.lane.b32.xlu1 %v2261_v13, %s1454_s1  ;;  %v801_v20 = vpop.f32.mrf.mxu0 }
 0x240   :  { %v438_v59 = vpop.permute.xlu1 %437  ;;  %v915_v35 = vadd.f32 %v914_v39, %v801_v20 }
 0x241   :  { %v2307_v42 = vmax.f32 %v2167_v15, %v438_v59  ;;  %v1119_v24 = vpop.f32.mrf.mxu2 }
 0x242   :  { %v1215_v19 = vadd.f32 %v1119_v24, %v909_v58 }
 0x243   :  { %597 = vrot.lane.b32.xlu2 %v2307_v42, %s1455_s23 }
 0x244   :  { %v1251_v3 = vadd.f32 %v2304_v25, %v1215_v19 }
 0x246   :  { %1283 = vst [vmem:[#allocation2] sm:$0xff] %v1251_v3 }
 0x247   :  { %985 = vmatmul.f32.gmra.mxu3 %v1644_v22 }
 0x248   :  { %v290_v61 = vpop.permute.xlu0 %289 }
 0x249   :  { %v2314_v5 = vmax.f32 %v2184_v44, %v290_v61  ;;  %v1122_v27 = vpop.f32.mrf.mxu2 }
 0x24a   :  { %v1216_v15 = vadd.f32 %v1122_v27, %v912_v57 }
 0x24b   :  { %449 = vrot.lane.b32.xlu0 %v2314_v5, %s1454_s1  ;;  %1355 = vmatmul.msk.f32.gmra.mxu0 %vm713_vm0, %v2314_v5 }
 0x24c   :  { %v1252_v38 = vadd.f32 %v2304_v25, %v1216_v15 }
 0x24e   :  { %1284 = vst [vmem:[#allocation2 + $0x8] sm:$0xff] %v1252_v38 }
 0x24f   :  { %988 = vmatmul.f32.gmra.mxu3 %v1602_v16  ;;  %v804_v16 = vpop.f32.mrf.mxu0 }
 0x250   :  { %v292_v22 = vpop.permute.xlu0 %291  ;;  %v918_v12 = vadd.f32 %v917_v4, %v804_v16 }
 0x251   :  { %v2323_v44 = vmax.f32 %v2191_v63, %v292_v22 }
 0x252   :  { %v1125_v2 = vpop.f32.mrf.mxu2 }
 0x253   :  { %v1217_v29 = vadd.f32 %v1125_v2, %v915_v35  ;;  %451 = vrot.lane.b32.xlu0 %v2323_v44, %s1454_s1  ;;  %1356 = vmatmul.msk.f32.gmra.mxu0 %vm713_vm0, %v2323_v44 }
 0x255   :  { %v1253_v46 = vadd.f32 %v2304_v25, %v1217_v29 }
 0x257   :  { %1285 = vst [vmem:[#allocation2 + $0x10] sm:$0xff] %v1253_v46  ;;  %991 = vmatmul.f32.gmra.mxu3 %v1673_v33  ;;  %v807_v47 = vpop.f32.mrf.mxu0  ;;  %v923_v33 = vpop.f32.mrf.mxu1 }
 0x25f   :  { %994 = vmatmul.f32.gmra.mxu3 %v1607_v17  ;;  %v810_v62 = vpop.f32.mrf.mxu0  ;;  %v926_v56 = vpop.f32.mrf.mxu1 }
 0x260   :  { %v924_v50 = vadd.f32 %v923_v33, %v810_v62 }
 0x261   :  { %v592_v52 = vpop.permute.xlu2 %591 }
 0x262   :  { %v674_v63 = vmax.f32 %v2222_v30, %v592_v52 }
 0x264   :  { %1378 = vmatmul.msk.f32.gmra.mxu2 %vm1005_vm1, %v674_v63 }
 0x267   :  { %997 = vmatmul.f32.gmra.mxu3 %v2535_v53  ;;  %v813_v21 = vpop.f32.mrf.mxu0  ;;  %v929_v58 = vpop.f32.mrf.mxu1 }
 0x268   :  { %v927_v18 = vadd.f32 %v926_v56, %v813_v21 }
 0x269   :  { %v594_v60 = vpop.permute.xlu2 %593 }
 0x26a   :  { %v675_v10 = vmax.f32 %v2236_v55, %v594_v60  ;;  %v921_v55 = vadd.f32 %v920_v41, %v807_v47 }
 0x26c   :  { %1379 = vmatmul.msk.f32.gmra.mxu2 %vm1005_vm1, %v675_v10 }
 0x26f   :  { %1000 = vmatmul.f32.gmra.mxu3 %v2536_v40 }
 0x271   :  { %v440_v17 = vpop.permute.xlu1 %439 }
 0x272   :  { %v2339_v51 = vmax.f32 %v2210_v34, %v440_v17  ;;  %v1128_v30 = vpop.f32.mrf.mxu2 }
 0x273   :  { %v1218_v31 = vadd.f32 %v1128_v30, %v918_v12 }
 0x274   :  { %599 = vrot.lane.b32.xlu2 %v2339_v51, %s1455_s23 }
 0x275   :  { %v1254_v53 = vadd.f32 %v2304_v25, %v1218_v31 }
 0x277   :  { %1286 = vst [vmem:[#allocation2 + $0x18] sm:$0xff] %v1254_v53 }
 0x279   :  { %v442_v43 = vpop.permute.xlu1 %441 }
 0x27a   :  { %v2345_v40 = vmax.f32 %v2219_v28, %v442_v43  ;;  %v1131_v7 = vpop.f32.mrf.mxu2  ;;  %v816_v28 = vpop.f32.mrf.mxu0 }
 0x27b   :  { %v1219_v11 = vadd.f32 %v1131_v7, %v921_v55  ;;  %v930_v38 = vadd.f32 %v929_v58, %v816_v28 }
 0x27c   :  { %601 = vrot.lane.b32.xlu2 %v2345_v40, %s1455_s23 }
 0x27d   :  { %v1255_v34 = vadd.f32 %v2304_v25, %v1219_v11 }
 0x27f   :  { %1287 = vst [vmem:[#allocation2 + $0x20] sm:$0xff] %v1255_v34 }
 0x281   :  { %v444_v14 = vpop.permute.xlu1 %443 }
 0x282   :  { %v2351_v37 = vmax.f32 %v2233_v8, %v444_v14  ;;  %v932_v8 = vpop.f32.mrf.mxu1  ;;  %v819_v15 = vpop.f32.mrf.mxu0 }
 0x283   :  { %v1134_v49 = vpop.f32.mrf.mxu2  ;;  %v933_v16 = vadd.f32 %v932_v8, %v819_v15 }
 0x284   :  { %v1220_v59 = vadd.f32 %v1134_v49, %v924_v50  ;;  %603 = vrot.lane.b32.xlu2 %v2351_v37, %s1455_s23 }
 0x286   :  { %v1256_v24 = vadd.f32 %v2304_v25, %v1220_v59 }
 0x288   :  { %1288 = vst [vmem:[#allocation2 + $0x28] sm:$0xff] %v1256_v24 }
 0x289   :  { %v294_v19 = vpop.permute.xlu0 %293  ;;  %v458_v57 = vpop.permute.xlu1 %457 }
 0x28a   :  { %v2357_v0 = vmax.f32 %v2247_v1, %v294_v19  ;;  %v935_v4 = vpop.f32.mrf.mxu1  ;;  %v2375_v52 = vmax.f32 %v2073_v54, %v458_v57 }
 0x28b   :  { %v1137_v3 = vpop.f32.mrf.mxu2 }
 0x28c   :  { %v1221_v61 = vadd.f32 %v1137_v3, %v927_v18  ;;  %453 = vrot.lane.b32.xlu0 %v2357_v0, %s1454_s1  ;;  %1357 = vmatmul.msk.f32.gmra.mxu0 %vm713_vm0, %v2357_v0 }
 0x28e   :  { %v1257_v27 = vadd.f32 %v2304_v25, %v1221_v61 }
 0x290   :  { %1289 = vst [vmem:[#allocation2 + $0x30] sm:$0xff] %v1257_v27 }
 0x291   :  { %v460_v2 = vpop.permute.xlu1 %459 }
 0x292   :  { %v446_v20 = vpop.permute.xlu0 %445  ;;  %v2378_v41 = vmax.f32 %v2146_v26, %v460_v2  ;;  %v938_v12 = vpop.f32.mrf.mxu1 }
 0x293   :  { %v2365_v39 = vmax.f32 %v2251_v6, %v446_v20  ;;  %v1140_v1 = vpop.f32.mrf.mxu2  ;;  %v822_v6 = vpop.f32.mrf.mxu0 }
 0x294   :  { %v1222_v22 = vadd.f32 %v1140_v1, %v930_v38  ;;  %455 = vrot.lane.b32.xlu0 %v1947_v36, %s1454_s1 }
 0x295   :  { %605 = vrot.lane.b32.xlu2 %v2365_v39, %s1455_s23  ;;  %v596_v35 = vpop.permute.xlu2 %595 }
 0x296   :  { %v1258_v29 = vadd.f32 %v2304_v25, %v1222_v22  ;;  %v676_v46 = vmax.f32 %v2294_v45, %v596_v35 }
 0x298   :  { %1290 = vst [vmem:[#allocation2 + $0x38] sm:$0xff] %v1258_v29  ;;  %1380 = vmatmul.msk.f32.gmra.mxu2 %vm1005_vm1, %v676_v46 }
 0x299   :  { %v462_v33 = vpop.permute.xlu1 %461 }
 0x29a   :  { %v448_v63 = vpop.permute.xlu0 %447  ;;  %v2393_v17 = vmax.f32 %v2151_v9, %v462_v33  ;;  %v941_v7 = vpop.f32.mrf.mxu1 }
 0x29b   :  { %v2381_v47 = vmax.f32 %v2265_v23, %v448_v63  ;;  %v1143_v60 = vpop.f32.mrf.mxu2  ;;  %v936_v23 = vadd.f32 %v935_v4, %v822_v6  ;;  %v825_v62 = vpop.f32.mrf.mxu0 }
 0x29c   :  { %v1223_v10 = vadd.f32 %v1143_v60, %v933_v16  ;;  %617 = vrot.lane.b32.xlu0 %v2375_v52, %s1455_s23  ;;  %v939_v55 = vadd.f32 %v938_v12, %v825_v62 }
 0x29d   :  { %619 = vrot.lane.b32.xlu2 %v2378_v41, %s1455_s23  ;;  %607 = vrot.lane.b32.xlu1 %v2381_v47, %s1455_s23  ;;  %v598_v54 = vpop.permute.xlu2 %597 }
 0x29e   :  { %v1259_v45 = vadd.f32 %v2304_v25, %v1223_v10  ;;  %v677_v26 = vmax.f32 %v2307_v42, %v598_v54  ;;  %v2431_v10 = vpop.f32.mrf.mxu3 }
 0x2a0   :  { %1291 = vst [vmem:[#allocation2 + $0x40] sm:$0xff] %v1259_v45  ;;  %1381 = vmatmul.msk.f32.gmra.mxu2 %vm1005_vm1, %v677_v26 }
 0x2a1   :  { %v464_v3 = vpop.permute.xlu1 %463 }
 0x2a2   :  { %v944_v49 = vpop.f32.mrf.mxu1  ;;  %v2407_v61 = vmax.f32 %v2194_v48, %v464_v3 }
 0x2a3   :  { %v1146_v30 = vpop.f32.mrf.mxu2  ;;  %v828_v56 = vpop.f32.mrf.mxu0 }
 0x2a4   :  { %v1224_v31 = vadd.f32 %v1146_v30, %v936_v23  ;;  %v942_v11 = vadd.f32 %v941_v7, %v828_v56 }
 0x2a5   :  { %621 = vrot.lane.b32.xlu1 %v2393_v17, %s1455_s23 }
 0x2a6   :  { %v1260_v53 = vadd.f32 %v2304_v25, %v1224_v31  ;;  %v2433_v54 = vpop.f32.mrf.mxu3 }
 0x2a8   :  { %1292 = vst [vmem:[#allocation2 + $0x48] sm:$0xff] %v1260_v53 }
 0x2aa   :  { %v947_v35 = vpop.f32.mrf.mxu1 }
 0x2ab   :  { %v1149_v42 = vpop.f32.mrf.mxu2  ;;  %v831_v50 = vpop.f32.mrf.mxu0 }
 0x2ac   :  { %v1225_v43 = vadd.f32 %v1149_v42, %v939_v55  ;;  %v945_v58 = vadd.f32 %v944_v49, %v831_v50 }
 0x2ae   :  { %v1261_v21 = vadd.f32 %v2304_v25, %v1225_v43  ;;  %v2440_v33 = vpop.f32.mrf.mxu3 }
 0x2b0   :  { %1293 = vst [vmem:[#allocation2 + $0x50] sm:$0xff] %v1261_v21 }
 0x2b2   :  { %v950_v4 = vpop.f32.mrf.mxu1 }
 0x2b3   :  { %v1152_v34 = vpop.f32.mrf.mxu2  ;;  %v834_v22 = vpop.f32.mrf.mxu0 }
 0x2b4   :  { %v1226_v9 = vadd.f32 %v1152_v34, %v942_v11 }
 0x2b6   :  { %v1262_v14 = vadd.f32 %v2304_v25, %v1226_v9 }
 0x2b8   :  { %1294 = vst [vmem:[#allocation2 + $0x58] sm:$0xff] %v1262_v14 }
 0x2ba   :  { %v953_v42 = vpop.f32.mrf.mxu1 }
 0x2bb   :  { %v1155_v59 = vpop.f32.mrf.mxu2  ;;  %v837_v46 = vpop.f32.mrf.mxu0 }
 0x2bc   :  { %v1227_v28 = vadd.f32 %v1155_v59, %v945_v58  ;;  %v951_v6 = vadd.f32 %v950_v4, %v837_v46 }
 0x2bd   :  { %v450_v24 = vpop.permute.xlu0 %449 }
 0x2be   :  { %v1263_v19 = vadd.f32 %v2304_v25, %v1227_v28  ;;  %v2402_v18 = vmax.f32 %v2314_v5, %v450_v24  ;;  %v466_v5 = vpop.permute.xlu1 %465 }
 0x2bf   :  { %v2417_v27 = vmax.f32 %v2201_v32, %v466_v5  ;;  %v948_v32 = vadd.f32 %v947_v35, %v834_v22 }
 0x2c0   :  { %1295 = vst [vmem:[#allocation2 + $0x60] sm:$0xff] %v1263_v19  ;;  %609 = vrot.lane.b32.xlu0 %v2402_v18, %s1455_s23 }
 0x2c2   :  { %v956_v9 = vpop.f32.mrf.mxu1 }
 0x2c5   :  { %v452_v57 = vpop.permute.xlu0 %451 }
 0x2c6   :  { %v2410_v8 = vmax.f32 %v2323_v44, %v452_v57 }
 0x2c8   :  { %623 = vrot.lane.b32.xlu0 %v2407_v61, %s1455_s23  ;;  %611 = vrot.lane.b32.xlu2 %v2410_v8, %s1455_s23 }
 0x2ce   :  { %v600_v15 = vpop.permute.xlu2 %599 }
 0x2cf   :  { %v678_v38 = vmax.f32 %v2339_v51, %v600_v15 }
 0x2d0   :  { %625 = vrot.lane.b32.xlu2 %v2417_v27, %s1455_s23 }
 0x2d1   :  { %1382 = vmatmul.msk.f32.gmra.mxu2 %vm1005_vm1, %v678_v38 }
 0x2d6   :  { %v602_v48 = vpop.permute.xlu2 %601 }
 0x2d7   :  { %v679_v44 = vmax.f32 %v2345_v40, %v602_v48 }
 0x2d9   :  { %1383 = vmatmul.msk.f32.gmra.mxu2 %vm1005_vm1, %v679_v44 }
 0x2de   :  { %v604_v20 = vpop.permute.xlu2 %603 }
 0x2df   :  { %v680_v1 = vmax.f32 %v2351_v37, %v604_v20 }
 0x2e1   :  { %1384 = vmatmul.msk.f32.gmra.mxu2 %vm1005_vm1, %v680_v1  ;;  %v959_v1 = vpop.f32.mrf.mxu1 }
 0x2e7   :  { %v1158_v2 = vpop.f32.mrf.mxu2 }
 0x2e8   :  { %v1228_v51 = vadd.f32 %v1158_v2, %v948_v32 }
 0x2e9   :  { %v962_v2 = vpop.f32.mrf.mxu1 }
 0x2ea   :  { %v1264_v29 = vadd.f32 %v2304_v25, %v1228_v51 }
 0x2ec   :  { %1296 = vst [vmem:[#allocation2 + $0x68] sm:$0xff] %v1264_v29 }
 0x2ef   :  { %v606_v16 = vpop.permute.xlu2 %605  ;;  %v1161_v40 = vpop.f32.mrf.mxu2 }
 0x2f0   :  { %v681_v63 = vmax.f32 %v2365_v39, %v606_v16  ;;  %v1229_v60 = vadd.f32 %v1161_v40, %v951_v6  ;;  %v468_v39 = vpop.permute.xlu1 %467 }
 0x2f1   :  { %v2443_v12 = vmax.f32 %v2261_v13, %v468_v39  ;;  %v840_v13 = vpop.f32.mrf.mxu0  ;;  %v965_v40 = vpop.f32.mrf.mxu1 }
 0x2f2   :  { %v1265_v37 = vadd.f32 %v2304_v25, %v1229_v60  ;;  %1385 = vmatmul.msk.f32.gmra.mxu2 %vm1005_vm1, %v681_v63  ;;  %v954_v7 = vadd.f32 %v953_v42, %v840_v13 }
 0x2f4   :  { %1297 = vst [vmem:[#allocation2 + $0x70] sm:$0xff] %v1265_v37 }
 0x2fe   :  { %v454_v45 = vpop.permute.xlu0 %453 }
 0x2ff   :  { %v2436_v26 = vmax.f32 %v2357_v0, %v454_v45  ;;  %v2452_v0 = vpop.f32.mrf.mxu3 }
 0x301   :  { %613 = vrot.lane.b32.xlu1 %v2436_v26, %s1455_s23 }
 0x306   :  { %v456_v23 = vpop.permute.xlu0 %455 }
 0x307   :  { %v2446_v62 = vmax.f32 %v1947_v36, %v456_v23  ;;  %v620_v36 = vpop.permute.xlu2 %619  ;;  %v2458_v43 = vpop.f32.mrf.mxu3 }
 0x308   :  { %v688_v56 = vmax.f32 %v2378_v41, %v620_v36 }
 0x309   :  { %627 = vrot.lane.b32.xlu1 %v2443_v12, %s1455_s23  ;;  %615 = vrot.lane.b32.xlu0 %v2446_v62, %s1455_s23 }
 0x30e   :  { %v618_v30 = vpop.permute.xlu0 %617 }
 0x30f   :  { %v608_v31 = vpop.permute.xlu1 %607  ;;  %v687_v53 = vmax.f32 %v2375_v52, %v618_v30  ;;  %v2464_v50 = vpop.f32.mrf.mxu3 }
 0x310   :  { %v682_v55 = vmax.f32 %v2381_v47, %v608_v31  ;;  %v843_v47 = vpop.f32.mrf.mxu0  ;;  %v968_v31 = vpop.f32.mrf.mxu1 }
 0x311   :  { %1391 = vmatmul.msk.f32.vlgmr.msra.gmra.mxu3 %vm1005_vm1, %v687_v53  ;;  %v957_v49 = vadd.f32 %v956_v9, %v843_v47 }
 0x312   :  { %1386 = vmatmul.msk.f32.gmra.mxu2 %vm1005_vm1, %v682_v55 }
 0x317   :  { %v622_v11 = vpop.permute.xlu1 %621  ;;  %v2468_v28 = vpop.f32.mrf.mxu3 }
 0x318   :  { %v689_v14 = vmax.f32 %v2393_v17, %v622_v11  ;;  %v846_v20 = vpop.f32.mrf.mxu0 }
 0x319   :  { %1392 = vmatmul.msk.f32.gmra.mxu3 %vm1005_vm1, %v688_v56 }
 0x31b   :  { %v1164_v21 = vpop.f32.mrf.mxu2 }
 0x31c   :  { %v1230_v34 = vadd.f32 %v1164_v21, %v954_v7 }
 0x31e   :  { %v1266_v52 = vadd.f32 %v2304_v25, %v1230_v34 }
 0x31f   :  { %v2470_v24 = vpop.f32.mrf.mxu3 }
 0x320   :  { %1298 = vst [vmem:[#allocation2 + $0x78] sm:$0xff] %v1266_v52  ;;  %v849_v32 = vpop.f32.mrf.mxu0 }
 0x321   :  { %1393 = vmatmul.msk.f32.gmra.mxu3 %vm1005_vm1, %v689_v14  ;;  %v963_v46 = vadd.f32 %v962_v2, %v849_v32  ;;  %v971_v14 = vpop.f32.mrf.mxu1 }
 0x322   :  { %v612_v17 = vpop.permute.xlu2 %611 }
 0x323   :  { %v1167_v58 = vpop.f32.mrf.mxu2  ;;  %v684_v5 = vmax.f32 %v2410_v8, %v612_v17  ;;  %v960_v8 = vadd.f32 %v959_v1, %v846_v20 }
 0x324   :  { %v1231_v41 = vadd.f32 %v1167_v58, %v957_v49 }
 0x326   :  { %v1267_v59 = vadd.f32 %v2304_v25, %v1231_v41 }
 0x327   :  { %v2476_v38 = vpop.f32.mrf.mxu3 }
 0x328   :  { %1299 = vst [vmem:[#allocation2 + $0x80] sm:$0xff] %v1267_v59  ;;  %v852_v16 = vpop.f32.mrf.mxu0 }
 0x329   :  { %v966_v63 = vadd.f32 %v965_v40, %v852_v16 }
 0x32a   :  { %v626_v48 = vpop.permute.xlu2 %625 }
 0x32b   :  { %v691_v44 = vmax.f32 %v2417_v27, %v626_v48 }
 0x330   :  { %v855_v30 = vpop.f32.mrf.mxu0 }
 0x331   :  { %v969_v55 = vadd.f32 %v968_v31, %v855_v30 }
 0x332   :  { %v610_v19 = vpop.permute.xlu0 %609 }
 0x333   :  { %v683_v3 = vmax.f32 %v2402_v18, %v610_v19  ;;  %v2482_v18 = vpop.f32.mrf.mxu3 }
 0x335   :  { %1387 = vmatmul.msk.f32.gmra.mxu2 %vm1005_vm1, %v683_v3 }
 0x338   :  { %v858_v9 = vpop.f32.mrf.mxu0 }
 0x339   :  { %v972_v58 = vadd.f32 %v971_v14, %v858_v9 }
 0x33a   :  { %v624_v57 = vpop.permute.xlu0 %623 }
 0x33b   :  { %v690_v15 = vmax.f32 %v2407_v61, %v624_v57  ;;  %v2484_v22 = vpop.f32.mrf.mxu3 }
 0x33d   :  { %1388 = vmatmul.msk.f32.gmra.mxu2 %vm1005_vm1, %v684_v5  ;;  %1394 = vmatmul.msk.f32.gmra.mxu3 %vm1005_vm1, %v690_v15 }
 0x340   :  { %v861_v1 = vpop.f32.mrf.mxu0 }
 0x343   :  { %v986_v29 = vpop.f32.mrf.mxu3 }
 0x344   :  { %v987_v49 = vadd.f32 %v986_v29, %v2433_v54 }
 0x345   :  { %1395 = vmatmul.msk.f32.gmra.mxu3 %vm1005_vm1, %v691_v44 }
 0x34b   :  { %v989_v60 = vpop.f32.mrf.mxu3 }
 0x353   :  { %v992_v23 = vpop.f32.mrf.mxu3 }
 0x354   :  { %v1170_v35 = vpop.f32.mrf.mxu2  ;;  %v993_v54 = vadd.f32 %v992_v23, %v2452_v0 }
 0x355   :  { %v1232_v61 = vadd.f32 %v1170_v35, %v960_v8  ;;  %v975_v8 = vadd.f32 %v2470_v24, %v861_v1 }
 0x357   :  { %v1268_v51 = vadd.f32 %v2304_v25, %v1232_v61 }
 0x359   :  { %1300 = vst [vmem:[#allocation2 + $0x88] sm:$0xff] %v1268_v51 }
 0x35b   :  { %v995_v56 = vpop.f32.mrf.mxu3 }
 0x35c   :  { %v1173_v4 = vpop.f32.mrf.mxu2  ;;  %v996_v51 = vadd.f32 %v995_v56, %v2458_v43 }
 0x35d   :  { %v1233_v27 = vadd.f32 %v1173_v4, %v963_v46 }
 0x35f   :  { %v1269_v6 = vadd.f32 %v2304_v25, %v1233_v27 }
 0x361   :  { %1301 = vst [vmem:[#allocation2 + $0x90] sm:$0xff] %v1269_v6 }
 0x363   :  { %v998_v47 = vpop.f32.mrf.mxu3 }
 0x364   :  { %v1176_v37 = vpop.f32.mrf.mxu2  ;;  %v999_v24 = vadd.f32 %v998_v47, %v2464_v50 }
 0x365   :  { %v1234_v45 = vadd.f32 %v1176_v37, %v966_v63 }
 0x367   :  { %v1270_v39 = vadd.f32 %v2304_v25, %v1234_v45 }
 0x369   :  { %1302 = vst [vmem:[#allocation2 + $0x98] sm:$0xff] %v1270_v39  ;;  %v984_v39 = vadd.f32 %v2484_v22, %v2431_v10 }
 0x373   :  { %v614_v53 = vpop.permute.xlu1 %613 }
 0x374   :  { %v685_v36 = vmax.f32 %v2436_v26, %v614_v53  ;;  %v1001_v26 = vpop.f32.mrf.mxu3 }
 0x375   :  { %v1179_v13 = vpop.f32.mrf.mxu2  ;;  %v1002_v23 = vadd.f32 %v1001_v26, %v2468_v28 }
 0x376   :  { %v1235_v42 = vadd.f32 %v1179_v13, %v969_v55  ;;  %1389 = vmatmul.msk.f32.gmra.mxu2 %vm1005_vm1, %v685_v36 }
 0x378   :  { %v1271_v7 = vadd.f32 %v2304_v25, %v1235_v42 }
 0x37a   :  { %1303 = vst [vmem:[#allocation2 + $0xa0] sm:$0xff] %v1271_v7 }
 0x37b   :  { %v628_v21 = vpop.permute.xlu1 %627  ;;  %v616_v11 = vpop.permute.xlu0 %615 }
 0x37c   :  { %v692_v34 = vmax.f32 %v2443_v12, %v628_v21  ;;  %v686_v52 = vmax.f32 %v2446_v62, %v616_v11  ;;  %v990_v62 = vadd.f32 %v989_v60, %v2440_v33  ;;  %v864_v33 = vpop.f32.mrf.mxu0 }
 0x37d   :  { %v978_v2 = vadd.f32 %v2476_v38, %v864_v33 }
 0x37e   :  { %1390 = vmatmul.msk.f32.gmra.mxu2 %vm1005_vm1, %v686_v52  ;;  %1396 = vmatmul.msk.f32.gmra.mxu3 %vm1005_vm1, %v692_v34 }
 0x384   :  { %v867_v38 = vpop.f32.mrf.mxu0 }
 0x385   :  { %v981_v43 = vadd.f32 %v2482_v18, %v867_v38 }
 0x394   :  { %v1197_v41 = vpop.f32.mrf.mxu3 }
 0x395   :  { %v1182_v59 = vpop.f32.mrf.mxu2  ;;  %v1241_v19 = vadd.f32 %v1197_v41, %v987_v49 }
 0x396   :  { %v1236_v3 = vadd.f32 %v1182_v59, %v972_v58 }
 0x397   :  { %v1277_v17 = vadd.f32 %v2304_v25, %v1241_v19 }
 0x398   :  { %v1272_v12 = vadd.f32 %v2304_v25, %v1236_v3 }
 0x399   :  { %1309 = vst [vmem:[#allocation2 + $0xd0] sm:$0xff] %v1277_v17 }
 0x39a   :  { %1304 = vst [vmem:[#allocation2 + $0xa8] sm:$0xff] %v1272_v12 }
 0x39c   :  { %v1200_v57 = vpop.f32.mrf.mxu3 }
 0x39d   :  { %v1242_v5 = vadd.f32 %v1200_v57, %v990_v62 }
 0x39f   :  { %v1278_v15 = vadd.f32 %v2304_v25, %v1242_v5 }
 0x3a1   :  { %1310 = vst [vmem:[#allocation2 + $0xd8] sm:$0xff] %v1278_v15 }
 0x3a4   :  { %v1203_v48 = vpop.f32.mrf.mxu3 }
 0x3a5   :  { %v1243_v44 = vadd.f32 %v1203_v48, %v993_v54 }
 0x3a7   :  { %v1279_v20 = vadd.f32 %v2304_v25, %v1243_v44 }
 0x3a9   :  { %1311 = vst [vmem:[#allocation2 + $0xe0] sm:$0xff] %v1279_v20 }
 0x3b8   :  { %v1185_v35 = vpop.f32.mrf.mxu2 }
 0x3b9   :  { %v1237_v61 = vadd.f32 %v1185_v35, %v975_v8 }
 0x3bb   :  { %v1273_v32 = vadd.f32 %v2304_v25, %v1237_v61 }
 0x3bd   :  { %1305 = vst [vmem:[#allocation2 + $0xb0] sm:$0xff] %v1273_v32 }
 0x3c0   :  { %v1188_v29 = vpop.f32.mrf.mxu2  ;;  %v1206_v0 = vpop.f32.mrf.mxu3 }
 0x3c1   :  { %v1238_v46 = vadd.f32 %v1188_v29, %v978_v2  ;;  %v1244_v4 = vadd.f32 %v1206_v0, %v996_v51 }
 0x3c3   :  { %v1274_v27 = vadd.f32 %v2304_v25, %v1238_v46  ;;  %v1280_v6 = vadd.f32 %v2304_v25, %v1244_v4 }
 0x3c5   :  { %1306 = vst [vmem:[#allocation2 + $0xb8] sm:$0xff] %v1274_v27 }
 0x3c6   :  { %1312 = vst [vmem:[#allocation2 + $0xe8] sm:$0xff] %v1280_v6 }
 0x3c8   :  { %v1209_v16 = vpop.f32.mrf.mxu3 }
 0x3c9   :  { %v1245_v40 = vadd.f32 %v1209_v16, %v999_v24 }
 0x3cb   :  { %v1281_v63 = vadd.f32 %v2304_v25, %v1245_v40 }
 0x3cd   :  { %1313 = vst [vmem:[#allocation2 + $0xf0] sm:$0xff] %v1281_v63 }
 0x3f9   :  { %v1191_v60 = vpop.f32.mrf.mxu2 }
 0x3fa   :  { %v1239_v37 = vadd.f32 %v1191_v60, %v981_v43 }
 0x3fc   :  { %v1275_v45 = vadd.f32 %v2304_v25, %v1239_v37 }
 0x3fe   :  { %1307 = vst [vmem:[#allocation2 + $0xc0] sm:$0xff] %v1275_v45 }
 0x401   :  { %v1194_v30 = vpop.f32.mrf.mxu2  ;;  %v1212_v50 = vpop.f32.mrf.mxu3 }
 0x402   :  { %v1240_v31 = vadd.f32 %v1194_v30, %v984_v39  ;;  %v1246_v18 = vadd.f32 %v1212_v50, %v1002_v23 }
 0x404   :  { %v1276_v53 = vadd.f32 %v2304_v25, %v1240_v31  ;;  %v1282_v55 = vadd.f32 %v2304_v25, %v1246_v18 }
 0x406   :  { %1308 = vst [vmem:[#allocation2 + $0xc8] sm:$0xff] %v1276_v53 }
 0x407   :  { %1314 = vst [vmem:[#allocation2 + $0xf8] sm:$0xff] %v1282_v55 }
 0x408   :  { %1327 = dma.vmem_to_hbm [thread:$0]  %s1320_s22, 4096, %s1322_s8, [#allocation3], %s1457_s9, %s1457_s9, %s1458_s10  }
 0x409   :  { %1450 = dma.done.wait [#allocation3], 4096  }
 0x40a   :  { %1451 = vsyncadd [#allocation3], 4294963200 }
 0x40b   :  { %1332 = vsyncpa [#allocation3], 1 }

</bundles_post_ra>
